<compile_context>
chip_gen: v6e
topology: v6e:2x2x1
jax: 0.10.0
libtpu: 0.0.40
codegen_flags: <defaults>
</compile_context>

<pallas_src>
import functools

import jax
import jax.numpy as jnp
from jax.experimental import pallas as pl
from jax.experimental.pallas import tpu as pltpu

_LANES = 128


def _general_relu_kernel(x_ref, o_ref, *, leak, sub, maxv):
    x = x_ref[...]
    if leak is not None:
        # F.leaky_relu(x, leak): x if x >= 0 else leak * x
        y = jnp.where(x >= 0, x, x * jnp.asarray(leak, x.dtype))
    else:
        y = jnp.maximum(x, jnp.asarray(0, x.dtype))
    if sub is not None:
        y = y - jnp.asarray(sub, x.dtype)
    if maxv is not None:
        y = jnp.minimum(y, jnp.asarray(maxv, x.dtype))
    o_ref[...] = y


def _general_relu_jnp(x, leak, sub, maxv):
    """Plain-jnp fallback for the <128-element tail / tiny inputs."""
    if leak is not None:
        y = jnp.where(x >= 0, x, x * jnp.asarray(leak, x.dtype))
    else:
        y = jnp.maximum(x, jnp.asarray(0, x.dtype))
    if sub is not None:
        y = y - jnp.asarray(sub, x.dtype)
    if maxv is not None:
        y = jnp.minimum(y, jnp.asarray(maxv, x.dtype))
    return y


@functools.lru_cache(maxsize=None)
def _vmem_capacity_bytes():
    """Per-generation VMEM capacity; conservative fallback = v7x per-TC (64 MiB)."""
    try:
        info = pltpu.get_tpu_info()
        cap = int(getattr(info, "vmem_capacity_bytes", 0) or 0)
        if cap > 0:
            return cap
    except Exception:
        pass
    return 64 << 20


def _block_plan(rows, sublane, itemsize, user_block_rows):
    """Pick (block_rows, vmem_limit_bytes) for the 1-D streaming grid."""
    vmem_cap = _vmem_capacity_bytes()
    # Ceiling that always leaves headroom for Mosaic internals (~48 MiB on
    # v7x's 64 MiB VMEM, ~96 MiB on v5e/v6e's 128 MiB).
    vmem_ceiling = max(16 << 20, min(vmem_cap * 3 // 4, vmem_cap - (8 << 20)))
    # 4 buffers: in + out, each double-buffered.
    max_block_bytes = max(sublane * _LANES * itemsize, (vmem_ceiling - (4 << 20)) // 4)
    max_block_rows = max(
        sublane, (max_block_bytes // (_LANES * itemsize)) // sublane * sublane
    )

    rows_aligned = pl.cdiv(rows, sublane) * sublane

    if user_block_rows is not None:
        br = pl.cdiv(int(user_block_rows), sublane) * sublane
    elif rows_aligned <= 1024:
        # Too small to be worth splitting across cores; one step covers all.
        br = rows_aligned
    else:
        # ~8 MiB default block: already past the HBM-roofline knee on v5e/v6e
        # and large enough to hide per-step grid overhead at v7x's 3.2 TB/s.
        target_rows = max(sublane, (8 << 20) // (_LANES * itemsize))
        num_steps = max(2, pl.cdiv(rows, target_rows))
        if num_steps % 2:
            num_steps += 1  # even step count: both v7x TensorCores get equal work
        br = pl.cdiv(pl.cdiv(rows, num_steps), sublane) * sublane
        br = max(br, 512)  # never shrink below ~512 rows (stay near roofline)

    br = int(min(max(br, sublane), max_block_rows))
    block_bytes = br * _LANES * itemsize
    vmem_limit = int(min(max(4 * block_bytes + (4 << 20), 16 << 20), vmem_ceiling))
    return br, vmem_limit


def general_relu(x, leak=None, sub=None, maxv=None, *, block_rows=None,
                 donate_input=False):
    """Pallas implementation of GeneralRelu.forward for arbitrary-shaped x.

    Set donate_input=True (and donate x to the enclosing jit) to let the
    output reuse the input's HBM buffer via input_output_aliases.
    """
    orig_shape = x.shape
    dtype = x.dtype
    n = x.size
    if n == 0:
        return x
    if (leak is not None or sub is not None or maxv is not None) and not jnp.issubdtype(
        dtype, jnp.floating
    ):
        raise ValueError(
            f"GeneralRelu with leak/sub/maxv expects a floating-point dtype, got {dtype}"
        )

    itemsize = jnp.dtype(dtype).itemsize
    # dtype-aware sublane packing: 8 (f32), 16 (bf16/f16), 32 (int8/fp8).
    sublane = 8 * max(1, 4 // itemsize)

    rows = n // _LANES
    tail_len = n % _LANES
    x_flat = x.reshape(-1)

    # Whole input smaller than one lane row: a kernel launch is not worth it.
    if rows == 0:
        return _general_relu_jnp(x_flat, leak, sub, maxv).reshape(orig_shape)

    block_rows_eff, vmem_limit = _block_plan(rows, sublane, itemsize, block_rows)
    grid = (pl.cdiv(rows, block_rows_eff),)

    kernel = functools.partial(_general_relu_kernel, leak=leak, sub=sub, maxv=maxv)

    # 128-aligned prefix goes through the kernel; the ragged tail (<128 elems)
    # is handled in jnp below -- no full-array pad or slice round trips.
    head = (x_flat[: rows * _LANES] if tail_len else x_flat).reshape(rows, _LANES)

    out_head = pl.pallas_call(
        kernel,
        out_shape=jax.ShapeDtypeStruct((rows, _LANES), dtype),
        grid_spec=pltpu.PrefetchScalarGridSpec(
            num_scalar_prefetch=0,
            grid=grid,
            in_specs=[pl.BlockSpec((block_rows_eff, _LANES), lambda i: (i, 0))],
            out_specs=pl.BlockSpec((block_rows_eff, _LANES), lambda i: (i, 0)),
        ),
        compiler_params=pltpu.CompilerParams(
            dimension_semantics=("parallel",),
            vmem_limit_bytes=vmem_limit,
        ),
        input_output_aliases=({0: 0} if donate_input else {}),
    )(head)

    if tail_len:
        tail_out = _general_relu_jnp(x_flat[rows * _LANES:], leak, sub, maxv)
        return jnp.concatenate([out_head.reshape(-1), tail_out]).reshape(orig_shape)
    return out_head.reshape(orig_shape)


if __name__ == "__main__":
    # GeneralRelu has no learned parameters; its config is set here.
    leak, sub, maxv = 0.1, 0.4, 6.0

    key = jax.random.PRNGKey(0)
    x = jax.random.normal(key, (2, 4, 16, 16), dtype=jnp.float32)  # NCHW, 2048 elems

    gr = jax.jit(functools.partial(general_relu, leak=leak, sub=sub, maxv=maxv))

    out = jax.block_until_ready(gr(x))
    ref = jnp.minimum(jnp.where(x >= 0, x, leak * x) - sub, maxv)
    assert out.shape == x.shape and out.dtype == x.dtype
    assert jnp.allclose(out, ref, atol=1e-6), "mismatch vs reference"

    # Default (leak=sub=maxv=None) pure-ReLU path.
    out2 = jax.block_until_ready(jax.jit(general_relu)(x))
    assert jnp.allclose(out2, jnp.maximum(x, 0.0), atol=1e-6)

    # Non-128-multiple size: 128-aligned prefix through kernel + jnp tail.
    x_odd = jax.random.normal(jax.random.PRNGKey(1), (3, 5, 31), dtype=jnp.float32)
    out3 = jax.block_until_ready(gr(x_odd))
    ref3 = jnp.minimum(jnp.where(x_odd >= 0, x_odd, leak * x_odd) - sub, maxv)
    assert out3.shape == x_odd.shape
    assert jnp.allclose(out3, ref3, atol=1e-6)

    # Tiny (<128 elements) input: pure-jnp fallback path.
    x_tiny = jax.random.normal(jax.random.PRNGKey(2), (3, 5, 7), dtype=jnp.float32)
    out_t = jax.block_until_ready(gr(x_tiny))
    ref_t = jnp.minimum(jnp.where(x_tiny >= 0, x_tiny, leak * x_tiny) - sub, maxv)
    assert jnp.allclose(out_t, ref_t, atol=1e-6)

    # bf16 path checks the dtype-aware sublane alignment.
    x_bf = x.astype(jnp.bfloat16)
    out4 = jax.block_until_ready(gr(x_bf))
    ref4 = jnp.minimum(
        jnp.where(x_bf >= 0, x_bf, x_bf * jnp.bfloat16(leak)) - jnp.bfloat16(sub),
        jnp.bfloat16(maxv),
    )
    assert out4.dtype == jnp.bfloat16
    assert jnp.allclose(out4.astype(jnp.float32), ref4.astype(jnp.float32), atol=1e-2)

    # Donated input: output reuses the input's HBM buffer via aliasing.
    gr_donate = jax.jit(
        lambda xin: general_relu(xin, leak=leak, sub=sub, maxv=maxv, donate_input=True),
        donate_argnums=(0,),
    )
    x_copy = x + 0.0
    out5 = jax.block_until_ready(gr_donate(x_copy))
    del x_copy  # buffer was donated; do not touch it afterwards
    assert jnp.allclose(out5, ref, atol=1e-6)

    print("KERNEL_OK")
</pallas_src>

<mosaic_0001>
module attributes {stable_mosaic.version = 11 : i64} {
  func.func @_general_relu_kernel(%arg0: i32, %arg1: memref<16x128xf32, #tpu.memory_space<vmem>>, %arg2: memref<16x128xf32, #tpu.memory_space<vmem>>) attributes {dimension_semantics = [#tpu.dimension_semantics<parallel>], iteration_bounds = array<i64: 1>, scalar_prefetch = 0 : i64, scratch_operands = 0 : i64, tpu.core_type = #tpu.core_type<tc>, window_params = [{transform_indices = @transform_0, window_bounds = array<i64: 16, 128>}, {transform_indices = @transform_1, window_bounds = array<i64: 16, 128>}]} {
    %c0 = arith.constant 0 : index
    %c0_0 = arith.constant 0 : index
    %0 = vector.load %arg1[%c0, %c0_0] : memref<16x128xf32, #tpu.memory_space<vmem>>, vector<16x128xf32>
    %cst = arith.constant 0.000000e+00 : f32
    %1 = vector.broadcast %cst : f32 to vector<16x128xf32>
    %2 = arith.cmpf oge, %0, %1 : vector<16x128xf32>
    %cst_1 = arith.constant 1.000000e-01 : f32
    %3 = vector.broadcast %cst_1 : f32 to vector<16x128xf32>
    %4 = arith.mulf %0, %3 : vector<16x128xf32>
    %5 = arith.select %2, %0, %4 : vector<16x128xi1>, vector<16x128xf32>
    %cst_2 = arith.constant 4.000000e-01 : f32
    %6 = vector.broadcast %cst_2 : f32 to vector<16x128xf32>
    %7 = arith.subf %5, %6 : vector<16x128xf32>
    %cst_3 = arith.constant 6.000000e+00 : f32
    %8 = vector.broadcast %cst_3 : f32 to vector<16x128xf32>
    %9 = arith.minimumf %7, %8 : vector<16x128xf32>
    %c0_4 = arith.constant 0 : index
    %c0_5 = arith.constant 0 : index
    %10 = vector.load %arg2[%c0_4, %c0_5] : memref<16x128xf32, #tpu.memory_space<vmem>>, vector<16x128xf32>
    tpu.vector_store %arg2[%c0_4, %c0_5], %9 {strides = array<i32>} : memref<16x128xf32, #tpu.memory_space<vmem>>, vector<16x128xf32>,
    return
  }
  func.func @transform_0(%arg0: i32) -> (i32, i32) {
    %c0_i32 = arith.constant 0 : i32
    %c0_i32_0 = arith.constant 0 : i32
    return %arg0, %c0_i32 : i32, i32
  }
  func.func @transform_1(%arg0: i32) -> (i32, i32) {
    %c0_i32 = arith.constant 0 : i32
    %c0_i32_0 = arith.constant 0 : i32
    return %arg0, %c0_i32 : i32, i32
  }
}

</mosaic_0001>

<bundles_post_ra>
// kernel: general_relu.1
= control target key start
LH: loop header
LB: loop body
LE: loop exit
PB: predicated region body
PF: predicated region fallthrough
CT: control target
= control target key end

     0   :  { %s50_s0 = inlined_call_operand.vmem [shape: f32[16,128], index: 0, kind: input, shape index: {}]   ;;  %s51_s1 = inlined_call_operand.vmem [shape: f32[16,128], index: 1, kind: output, shape index: {}]  }
   0x1   :  { %v8_v0 = vld [vmem:[%s50_s0] sm:$0xff]  ;;  %v9_v1 = vld [vmem:[%s50_s0 + $0x8] sm:$0xff] }
   0x2   :  { %vm10_vm0 = vcmp.ge.f32.partialorder %v8_v0, 0.0  ;;  %v12_v2 = vmul.f32 0.1, %v8_v0  ;;  %vm11_vm1 = vcmp.ge.f32.partialorder %v9_v1, 0.0  ;;  %v13_v3 = vmul.f32 0.1, %v9_v1 }
   0x4   :  { %v14_v4 = vsel %vm10_vm0, %v8_v0, %v12_v2  ;;  %v15_v5 = vsel %vm11_vm1, %v9_v1, %v13_v3 }
   0x5   :  { %v26_v6 = vadd.f32 -0.4, %v14_v4  ;;  %v27_v7 = vadd.f32 -0.4, %v15_v5 }
   0x7   :  { %v18_v8 = vmin.f32 %v26_v6, 6.0  ;;  %v19_v9 = vmin.f32 %v27_v7, 6.0 }
   0x9   :  { %20 = vst [vmem:[%s51_s1] sm:$0xff] %v18_v8  ;;  %21 = vst [vmem:[%s51_s1 + $0x8] sm:$0xff] %v19_v9 }

</bundles_post_ra>
